<compile_context>
chip_gen: v6e
topology: v6e:2x2x1
jax: 0.10.0
libtpu: 0.0.40
codegen_flags: <defaults>
</compile_context>

<pallas_src>
import jax
import jax.numpy as jnp
from jax.experimental import pallas as pl
from jax.experimental.pallas import tpu as pltpu

LANE = 128            # vreg lane width
SUBLANE = 8           # vreg sublane count (f32)
TILE_B = 2048         # batch rows per grid step on the tiled path (sweepable)
GRIDLESS_MAX_B = 2048 # up to this many rows: single grid-less invocation


def _round_up(n, m):
    return (n + m - 1) // m * m


def classy_nn_kernel(x_ref, w1_ref, b1_ref, w2_ref, b2_ref, out_ref):
    # fc1: bf16 MXU inputs, f32 accumulation; bias + ReLU in f32 on the VPU.
    h = jnp.dot(x_ref[...], w1_ref[...], preferred_element_type=jnp.float32)
    h = jnp.maximum(h + b1_ref[...], 0.0)

    # fc2 into the (unpadded) class axis; zero-padded hidden rows of W2
    # contribute exactly 0.
    logits = jnp.dot(h.astype(jnp.bfloat16), w2_ref[...],
                     preferred_element_type=jnp.float32) + b2_ref[...]

    # Numerically stable, *exact* softmax over the class axis (dim=1).
    m = jnp.max(logits, axis=-1, keepdims=True)        # XLU
    e = jnp.exp(logits - m)                            # EUP
    denom = jnp.sum(e, axis=-1, keepdims=True)         # XLU
    out_ref[...] = (e / denom).astype(out_ref.dtype)   # exact divide


def prepare_params(w1, b1, w2, b2):
    """One-time parameter prep, hoisted out of the forward path.

    Pads the hidden dim to a full 128-lane vreg (exact: ReLU(0) = 0 and the
    padded W2 rows are 0), stores the matmul operands in bf16 (f32 accum in
    the kernel) and the biases in f32. Weights are (in, out) so the kernel
    computes x @ W == torch's x @ W.T.
    """
    in_size, hidden = w1.shape
    out_size = w2.shape[1]
    h_pad = _round_up(max(hidden, LANE), LANE)

    w1p = jnp.zeros((in_size, h_pad), jnp.bfloat16).at[:, :hidden].set(
        w1.astype(jnp.bfloat16))
    b1p = jnp.zeros((1, h_pad), jnp.float32).at[:, :hidden].set(
        b1.reshape(1, hidden).astype(jnp.float32))
    w2p = jnp.zeros((h_pad, out_size), jnp.bfloat16).at[:hidden, :].set(
        w2.astype(jnp.bfloat16))
    b2p = b2.reshape(1, out_size).astype(jnp.float32)
    return w1p, b1p, w2p, b2p


def classy_nn_forward(x, w1p, b1p, w2p, b2p):
    """Pallas forward for ClassyNN: softmax(relu(x @ W1 + b1) @ W2 + b2, axis=1)."""
    batch, in_size = x.shape
    h_pad = w1p.shape[1]
    out_size = w2p.shape[1]

    # bf16 x: halves the HBM read; it feeds the MXU anyway.
    xb = x.astype(jnp.bfloat16)

    # ---- Batch padding / tiling decision. ------------------------------------
    if batch <= GRIDLESS_MAX_B:
        b_pad = _round_up(batch, SUBLANE)
        n_tiles, tb = 1, b_pad
    else:
        b_pad = _round_up(batch, TILE_B)
        n_tiles, tb = b_pad // TILE_B, TILE_B
    if b_pad != batch:
        xb = jnp.zeros((b_pad, in_size), jnp.bfloat16).at[:batch].set(xb)

    out_shape = jax.ShapeDtypeStruct((b_pad, out_size), jnp.float32)

    if n_tiles == 1:
        # Small / mid-size batch: single invocation, no grid, everything VMEM-resident.
        vmem = pl.BlockSpec(memory_space=pltpu.MemorySpace.VMEM)
        out = pl.pallas_call(
            classy_nn_kernel,
            out_shape=out_shape,
            in_specs=[vmem, vmem, vmem, vmem, vmem],
            out_specs=vmem,
        )(xb, w1p, b1p, w2p, b2p)
    else:
        # Batch-tiled: weights/biases keep a constant block index (VMEM-resident
        # across grid steps); batch axis is "parallel" (uses both TCs on v7x).
        out = pl.pallas_call(
            classy_nn_kernel,
            out_shape=out_shape,
            grid=(n_tiles,),
            in_specs=[
                pl.BlockSpec((tb, in_size), lambda i: (i, 0)),
                pl.BlockSpec((in_size, h_pad), lambda i: (0, 0)),
                pl.BlockSpec((1, h_pad), lambda i: (0, 0)),
                pl.BlockSpec((h_pad, out_size), lambda i: (0, 0)),
                pl.BlockSpec((1, out_size), lambda i: (0, 0)),
            ],
            out_specs=pl.BlockSpec((tb, out_size), lambda i: (i, 0)),
            compiler_params=pltpu.CompilerParams(
                dimension_semantics=("parallel",)),
        )(xb, w1p, b1p, w2p, b2p)

    return out[:batch]


def init_params(key, input_size, hidden_size, output_size):
    """nn.Linear-style U(-1/sqrt(fan_in), 1/sqrt(fan_in)) init, fp32."""
    k1, k2, k3, k4 = jax.random.split(key, 4)
    bound1 = 1.0 / jnp.sqrt(jnp.float32(input_size))
    bound2 = 1.0 / jnp.sqrt(jnp.float32(hidden_size))
    w1 = jax.random.uniform(k1, (input_size, hidden_size), jnp.float32, -bound1, bound1)
    b1 = jax.random.uniform(k2, (1, hidden_size), jnp.float32, -bound1, bound1)
    w2 = jax.random.uniform(k3, (hidden_size, output_size), jnp.float32, -bound2, bound2)
    b2 = jax.random.uniform(k4, (1, output_size), jnp.float32, -bound2, bound2)
    return w1, b1, w2, b2


def reference_forward(x, w1, b1, w2, b2):
    """Plain-JAX reference using the same bf16-in / f32-accum precision path."""
    h = jnp.dot(x.astype(jnp.bfloat16), w1.astype(jnp.bfloat16),
                preferred_element_type=jnp.float32) + b1.astype(jnp.float32)
    h = jnp.maximum(h, 0.0)
    logits = jnp.dot(h.astype(jnp.bfloat16), w2.astype(jnp.bfloat16),
                     preferred_element_type=jnp.float32) + b2.astype(jnp.float32)
    return jax.nn.softmax(logits, axis=1)


if __name__ == "__main__":
    input_size, hidden_size, output_size = 16, 32, 8

    key = jax.random.PRNGKey(0)
    kx, kp, kx2 = jax.random.split(key, 3)
    w1, b1, w2, b2 = init_params(kp, input_size, hidden_size, output_size)
    params = prepare_params(w1, b1, w2, b2)   # one-time prep, hoisted out of forward

    # --- Small batch: exercises the grid-less, fully VMEM-resident path. ------
    batch = 8
    x = jax.random.normal(kx, (batch, input_size), jnp.float32)
    out = jax.block_until_ready(classy_nn_forward(x, *params))
    ref = reference_forward(x, w1, b1, w2, b2)
    assert out.shape == (batch, output_size)
    assert jnp.allclose(out, ref, atol=2e-3, rtol=2e-3), "small-batch mismatch vs ref"
    assert jnp.allclose(jnp.sum(out, axis=1), 1.0, atol=1e-3), "rows must sum to 1"

    # --- Larger batch: exercises the batch-tiled, weight-resident grid path
    #     (2 grid steps of TILE_B rows; "parallel" batch axis). -----------------
    batch2 = 2 * TILE_B
    x2 = jax.random.normal(kx2, (batch2, input_size), jnp.float32)
    out2 = jax.block_until_ready(classy_nn_forward(x2, *params))
    ref2 = reference_forward(x2, w1, b1, w2, b2)
    assert out2.shape == (batch2, output_size)
    assert jnp.allclose(out2, ref2, atol=2e-3, rtol=2e-3), "tiled-batch mismatch vs ref"
    assert jnp.allclose(jnp.sum(out2, axis=1), 1.0, atol=1e-3), "rows must sum to 1"

    print("KERNEL_OK")
</pallas_src>

<mosaic_0001>
module attributes {stable_mosaic.version = 11 : i64} {
  func.func @classy_nn_kernel(%arg0: memref<8x16xbf16, #tpu.memory_space<vmem>>, %arg1: memref<16x128xbf16, #tpu.memory_space<vmem>>, %arg2: memref<1x128xf32, #tpu.memory_space<vmem>>, %arg3: memref<128x8xbf16, #tpu.memory_space<vmem>>, %arg4: memref<1x8xf32, #tpu.memory_space<vmem>>, %arg5: memref<8x8xf32, #tpu.memory_space<vmem>>) attributes {dimension_semantics = [], scalar_prefetch = 0 : i64, scratch_operands = 0 : i64, tpu.core_type = #tpu.core_type<tc>} {
    %c0 = arith.constant 0 : index
    %c0_0 = arith.constant 0 : index
    %0 = vector.load %arg0[%c0, %c0_0] : memref<8x16xbf16, #tpu.memory_space<vmem>>, vector<8x16xbf16>
    %c0_1 = arith.constant 0 : index
    %c0_2 = arith.constant 0 : index
    %1 = vector.load %arg1[%c0_1, %c0_2] : memref<16x128xbf16, #tpu.memory_space<vmem>>, vector<16x128xbf16>
    %cst = arith.constant dense<0.000000e+00> : vector<8x128xf32>
    %2 = tpu.matmul %0, %1, %cst {dimension_numbers = #tpu.dot_dimension_numbers<[1], [0], [0], [1], [0, 0, 1, 1], [], []>} : vector<8x16xbf16>, vector<16x128xbf16>, vector<8x128xf32> -> vector<8x128xf32>
    %c0_3 = arith.constant 0 : index
    %c0_4 = arith.constant 0 : index
    %3 = vector.load %arg2[%c0_3, %c0_4] : memref<1x128xf32, #tpu.memory_space<vmem>>, vector<1x128xf32>
    %4 = vector.broadcast %3 : vector<1x128xf32> to vector<8x128xf32>
    %5 = arith.addf %2, %4 : vector<8x128xf32>
    %cst_5 = arith.constant 0.000000e+00 : f32
    %6 = vector.broadcast %cst_5 : f32 to vector<8x128xf32>
    %7 = arith.maximumf %5, %6 : vector<8x128xf32>
    %8 = arith.truncf %7 : vector<8x128xf32> to vector<8x128xbf16>
    %c0_6 = arith.constant 0 : index
    %c0_7 = arith.constant 0 : index
    %9 = vector.load %arg3[%c0_6, %c0_7] : memref<128x8xbf16, #tpu.memory_space<vmem>>, vector<128x8xbf16>
    %cst_8 = arith.constant dense<0.000000e+00> : vector<8x8xf32>
    %10 = tpu.matmul %8, %9, %cst_8 {dimension_numbers = #tpu.dot_dimension_numbers<[1], [0], [0], [1], [0, 0, 1, 1], [], []>} : vector<8x128xbf16>, vector<128x8xbf16>, vector<8x8xf32> -> vector<8x8xf32>
    %c0_9 = arith.constant 0 : index
    %c0_10 = arith.constant 0 : index
    %11 = vector.load %arg4[%c0_9, %c0_10] : memref<1x8xf32, #tpu.memory_space<vmem>>, vector<1x8xf32>
    %12 = vector.broadcast %11 : vector<1x8xf32> to vector<8x8xf32>
    %13 = arith.addf %10, %12 : vector<8x8xf32>
    %cst_11 = arith.constant dense<0xFF800000> : vector<8xf32>
    %14 = vector.multi_reduction <maximumf>, %13, %cst_11 [1] : vector<8x8xf32> to vector<8xf32>
    %15 = vector.shape_cast %14 : vector<8xf32> to vector<8x1xf32>
    %16 = vector.broadcast %15 : vector<8x1xf32> to vector<8x8xf32>
    %17 = arith.subf %13, %16 : vector<8x8xf32>
    %18 = math.exp %17 : vector<8x8xf32>
    %cst_12 = arith.constant dense<0.000000e+00> : vector<8xf32>
    %19 = vector.multi_reduction <add>, %18, %cst_12 [1] : vector<8x8xf32> to vector<8xf32>
    %20 = vector.shape_cast %19 : vector<8xf32> to vector<8x1xf32>
    %21 = vector.broadcast %20 : vector<8x1xf32> to vector<8x8xf32>
    %22 = arith.divf %18, %21 : vector<8x8xf32>
    %c0_13 = arith.constant 0 : index
    %c0_14 = arith.constant 0 : index
    %23 = vector.load %arg5[%c0_13, %c0_14] : memref<8x8xf32, #tpu.memory_space<vmem>>, vector<8x8xf32>
    tpu.vector_store %arg5[%c0_13, %c0_14], %22 {strides = array<i32>} : memref<8x8xf32, #tpu.memory_space<vmem>>, vector<8x8xf32>,
    return
  }
}

</mosaic_0001>

<bundles_post_ra>
// kernel: tpu_custom_call.1
= control target key start
LH: loop header
LB: loop body
LE: loop exit
PB: predicated region body
PF: predicated region fallthrough
CT: control target
= control target key end

     0   :  { %v309_v1 = vmov 0.0   ;;  %vm310_vm0 = vmmov 0   ;;  %vm38_vm1 = vcmask 130048   ;;  %s384_s0 = inlined_call_operand.vmem [shape: bf16[8,16], index: 0, kind: input, shape index: {}]   ;;  %s385_s1 = inlined_call_operand.vmem [shape: bf16[16,128], index: 1, kind: input, shape index: {}]   ;;  %s386_s2 = inlined_call_operand.vmem [shape: f32[1,128], index: 2, kind: input, shape index: {}]   ;;  %s387_s3 = inlined_call_operand.vmem [shape: bf16[128,8], index: 3, kind: input, shape index: {}]   ;;  %s388_s4 = inlined_call_operand.vmem [shape: f32[1,8], index: 4, kind: input, shape index: {}]   ;;  %s389_s5 = inlined_call_operand.hbm [shape: f32[8,8], index: 5, kind: output, shape index: {}]  }
   0x1   :  { %v274_v0 = vld [vmem:[%s385_s1] sm:$0xff]   ;;  %245 = vmatprep.subr.bf16.mxu0 %v309_v1  ;;  %251 = vmatprep.subr.bf16.mxu1 %v309_v1  ;;  %v275_v3 = vld [vmem:[%s387_s3 + $0x38] sm:$0xff]   ;;  %v276_v4 = vld [vmem:[%s387_s3 + $0x30] sm:$0xff]  }
   0x2   :  { %v22_v2 = vld [vmem:[%s384_s0] sm:$0xf]  ;;  %246 = vmatpush3.bf16.msra.mxu0 %v274_v0  ;;  %247 = vmatprep.mubr.msk.bf16.mxu0 %vm310_vm0, %v309_v1  ;;  %v277_v5 = vld [vmem:[%s387_s3 + $0x28] sm:$0xff]  }
   0x3   :  { %267 = vmatprep.mubr.msk.bf16.mxu1 %vm310_vm0, %v309_v1  ;;  %252 = vmatpush3.bf16.msra.mxu1 %v275_v3 }
   0x4   :  { %253 = vmatprep.subr.bf16.mxu1 %v309_v1 }
   0x5   :  { %248 = vmatmul.mubr.msk.bf16.vlgmr.msra.gmra.mxu0 %vm38_vm1, %v22_v2 }
   0x7   :  { %254 = vmatpush3.bf16.msra.mxu1 %v276_v4 }
   0x8   :  { %255 = vmatprep.subr.bf16.mxu1 %v309_v1 }
   0x9   :  { %10 = vsyncpa [#allocation3], 0  ;;  %v278_v6 = vld [vmem:[%s387_s3 + $0x20] sm:$0xff]   ;;  %v279_v7 = vld [vmem:[%s387_s3 + $0x18] sm:$0xff]   ;;  %vm195_vm2 = vcmask 64512  }
   0xa   :  { %v280_v8 = vld [vmem:[%s387_s3 + $0x10] sm:$0xff]   ;;  %v281_v9 = vld [vmem:[%s387_s3 + $0x8] sm:$0xff]   ;;  %v282_v10 = vld [vmem:[%s387_s3] sm:$0xff]  }
   0xb   :  { %256 = vmatpush3.bf16.msra.mxu1 %v277_v5  ;;  %v222_v11 = vld [vmem:[%s386_s2] ss:$0 sm:$0xff]  ;;  %s311_s2 = smov [#allocation2]  }
   0xc   :  { %257 = vmatprep.subr.bf16.mxu1 %v309_v1  ;;  %v225_v19 = vld [vmem:[%s388_s4] ss:$0 sm:$0xff]  ;;  %s214_s3 = sshll.u32 %s311_s2, 4  ;;  %s215_s3 = int_to_ptr.vmem [resolvable:$true] %s214_s3 }
   0xd   :  { %s287_s4 = scalar_lea.vmem %s215_s3, 128  ;;  %p292_p1 = scmp.lt.s32.totalorder %s215_s3, %s215_s3 }
   0xe   :  { %p288_p0 = scmp.ne.s32.totalorder %s215_s3, %s287_s4  ;;  %p293_p2 = scmp.lt.s32.totalorder %s287_s4, %s287_s4 }
   0xf   :  { %258 = vmatpush3.bf16.msra.mxu1 %v278_v6 }
  0x10   :  { %259 = vmatprep.subr.bf16.mxu1 %v309_v1  ;;  %p294_p3 = por %p293_p2, %p292_p1 }
  0x12   :  { %p295_p4 = pnand %p294_p3, %p288_p0 }
  0x13   :  { %260 = vmatpush3.bf16.msra.mxu1 %v279_v7 }
  0x14   :  { %261 = vmatprep.subr.bf16.mxu1 %v309_v1 }
  0x17   :  { %262 = vmatpush3.bf16.msra.mxu1 %v280_v8 }
  0x18   :  { %263 = vmatprep.subr.bf16.mxu1 %v309_v1 }
  0x1b   :  { %264 = vmatpush3.bf16.msra.mxu1 %v281_v9 }
  0x1c   :  { %265 = vmatprep.subr.bf16.mxu1 %v309_v1 }
  0x1f   :  { %266 = vmatpush3.bf16.msra.mxu1 %v282_v10 }
  0xc5   :  { %v76_v12 = vpop.f32.mrf.mxu0 }
  0xc6   :  { %v77_v13 = vadd.f32 %v222_v11, %v76_v12 }
  0xc7   :  { %v249_v14 = vpop.f32.mrf.mxu0 }
  0xc8   :  { %v82_v15 = vmax.f32 %v77_v13, 0.0 }
  0xc9   :  { %v79_v16 = vpop.f32.mrf.mxu0 }
  0xca   :  { %v83_v17 = vpack.c.bf16 %v82_v15, %v82_v15 }
  0xcb   :  { %v250_v18 = vpop.f32.mrf.mxu0 }
  0xcc   :  { %268 = vmatmul.mubr.bf16.vlgmr.msra.gmra.mxu1 %v83_v17 }
 0x18c   :  { %v189_v20 = vpop.f32.mrf.mxu1 }
 0x18d   :  { %v190_v21 = vadd.f32 %v225_v19, %v189_v20 }
 0x18e   :  { %v269_v22 = vpop.f32.mrf.mxu1 }
 0x18f   :  { %v196_v23 = vsel %vm195_vm2, %v190_v21, -inf }
 0x190   :  { %197 = vmax.xlane.f32.xlu0 %v196_v23  ;;  %v192_v24 = vpop.f32.mrf.mxu1 }
 0x192   :  { %v270_v25 = vpop.f32.mrf.mxu1 }
 0x219   :  { %v198_v26 = vpop.xlane.xlu0 %197 }
 0x21a   :  { %v199_v27 = vsub.f32 %v190_v21, %v198_v26 }
 0x21c   :  { %v200_v28 = vmul.f32 1.442695, %v199_v27 }
 0x21e   :  { %283 = vpow2.f32 %v200_v28 }
 0x22b   :  { %v284_v29 = vpop.eup %283 }
 0x22c   :  { %v202_v30 = vsel %vm195_vm2, %v284_v29, 0.0 }
 0x22d   :  { %203 = vadd.xlane.f32.xlu0 %v202_v30 }
 0x2b6   :  { %v204_v31 = vpop.xlane.xlu0 %203 }
 0x2b7   :  { %285 = vrcp.f32 %v204_v31 }
 0x2c4   :  { %v286_v32 = vpop.eup %285 }
 0x2c5   :  { %v206_v33 = vmul.f32 %v286_v32, %v284_v29 }
 0x2c7   :  { %207 = vst.msk [vmem:[#allocation2] sm:$0xff] %vm195_vm2, %v206_v33 }
 0x2c8   :  { %298 = shalt.err (!%p295_p4)
}
 0x2c9   :  { %217 = dma.vmem_to_hbm [thread:$0]  %s215_s3, 128, %s389_s5, [#allocation3]  }
 0x2ca   :  { %307 = dma.done.wait [#allocation3], 128  }
 0x2cb   :  { %308 = vsyncadd [#allocation3], 4294967168 }
 0x2cc   :  { %221 = vsyncpa [#allocation3], 1 }

</bundles_post_ra>
